<compile_context>
chip_gen: v7x
topology: tpu7x:2x2x1
jax: 0.10.0
libtpu: 0.0.40
codegen_flags: <defaults>
</compile_context>

<pallas_src>
import jax
import jax.numpy as jnp
from jax.experimental import pallas as pl
from jax.experimental.pallas import tpu as pltpu

LANE = 128


def _round_up(x, m):
    return (x + m - 1) // m * m


def _feature_pad(d):
    # 256-align genuinely large widths (v6e/v7x MXU tiles are 2x256^2);
    # 128 is enough for small dims (avoid doubling zero-FLOPs on tiny layers).
    return _round_up(d, 256) if d >= 256 else _round_up(d, LANE)


def _pad_cols(a, to):
    pad = to - a.shape[-1]
    if pad <= 0:
        return a
    return jnp.pad(a, [(0, 0)] * (a.ndim - 1) + [(0, pad)])


def _pad_rows(a, to):
    pad = to - a.shape[0]
    if pad <= 0:
        return a
    return jnp.pad(a, [(0, pad)] + [(0, 0)] * (a.ndim - 1))


def _physical_vmem_bytes():
    # v5e/v6e: 128 MiB/TC, v7x: 64 MiB/TC. Query when available, else assume
    # the smallest (v7x) so the limit is always safe.
    try:
        return int(pltpu.get_tpu_info().vmem_capacity_bytes)
    except Exception:
        return 64 * 1024 * 1024


# ----------------------------- Fused Pallas kernel ---------------------------


def _make_fused_mlp_kernel(num_layers, matmul_dtype):
    """num_layers = number of (W, b) pairs, including the output head."""

    def kernel(x_ref, *refs):
        o_ref = refs[-1]
        h = x_ref[...]                                   # (TM, Din_pad) f32
        for i in range(num_layers):
            w = refs[2 * i][...]                         # (Din_i, Dout_i) bf16
            b = refs[2 * i + 1][...]                     # (1, Dout_i)     f32
            # bf16 MXU inputs, f32 accumulate, f32 epilogue (v5e VPU has no bf16).
            acc = jnp.dot(h.astype(matmul_dtype), w,
                          preferred_element_type=jnp.float32)
            h = acc + b
            if i < num_layers - 1:
                h = jnp.maximum(h, 0.0)                  # ReLU (BN folded, dropout=id)
        o_ref[...] = h                                   # lane-dense store

    return kernel


# --------------------------- Parameter preparation ---------------------------


def init_simple_mlp_params(key, input_dim, hidden_dims, output_dim=1):
    """Mimic PyTorch nn.Linear init (uniform +-1/sqrt(fan_in)).

    BatchNorm params are randomized (instead of PyTorch's identity defaults)
    so the BN-folding path is actually exercised by the correctness check.
    Weights are stored transposed: (in_features, out_features)."""
    params = []
    last_dim = input_dim
    for h in hidden_dims:
        key, kw, kb, kg, kbt, km, kv = jax.random.split(key, 7)
        bound = 1.0 / jnp.sqrt(last_dim)
        w = jax.random.uniform(kw, (last_dim, h), jnp.float32, -bound, bound)
        b = jax.random.uniform(kb, (h,), jnp.float32, -bound, bound)
        gamma = jax.random.uniform(kg, (h,), jnp.float32, 0.5, 1.5)
        beta = jax.random.uniform(kbt, (h,), jnp.float32, -0.1, 0.1)
        running_mean = jax.random.uniform(km, (h,), jnp.float32, -0.2, 0.2)
        running_var = jax.random.uniform(kv, (h,), jnp.float32, 0.5, 1.5)
        params.append(dict(w=w, b=b, gamma=gamma, beta=beta,
                           mean=running_mean, var=running_var))
        last_dim = h
    key, kw, kb = jax.random.split(key, 3)
    bound = 1.0 / jnp.sqrt(last_dim)
    w_out = jax.random.uniform(kw, (last_dim, output_dim), jnp.float32, -bound, bound)
    b_out = jax.random.uniform(kb, (output_dim,), jnp.float32, -bound, bound)
    return params, (w_out, b_out)


def prepare_fused_params(input_dim, hidden_params, head_params, eps=1e-5,
                         matmul_dtype=jnp.bfloat16):
    """Fold BN into Linear, zero-pad feature dims (incl. input dim) to lane
    multiples, and cast weights to the MXU dtype.

    Padded output columns compute 0*x + 0 = 0, ReLU(0) = 0, and the next
    layer's weight rows for padded features are zero, so padding is exact."""
    weights, biases = [], []
    prev_pad = _round_up(input_dim, LANE)       # x is padded to this in the wrapper
    for p in hidden_params:
        scale = p["gamma"] * jax.lax.rsqrt(p["var"] + eps)          # (Dout,)
        w = p["w"] * scale[None, :]
        b = (p["b"] - p["mean"]) * scale + p["beta"]
        dout_pad = _feature_pad(w.shape[1])
        w = _pad_rows(w, prev_pad)
        w = _pad_cols(w, dout_pad)
        b = _pad_cols(b.reshape(1, -1), dout_pad)                   # (1, Dout_pad)
        weights.append(w.astype(matmul_dtype))
        biases.append(b.astype(jnp.float32))                        # f32 epilogue
        prev_pad = dout_pad
    w_out, b_out = head_params
    out_dim = w_out.shape[1]
    out_pad = _round_up(out_dim, LANE)
    w_out = _pad_rows(w_out, prev_pad)
    w_out = _pad_cols(w_out, out_pad)
    b_out = _pad_cols(b_out.reshape(1, -1), out_pad)
    weights.append(w_out.astype(matmul_dtype))
    biases.append(b_out.astype(jnp.float32))
    return weights, biases, out_dim


# ------------------------------ Tiling / VMEM policy --------------------------


def _choose_tm(B):
    B8 = _round_up(B, 8)
    if B8 >= 2048:
        return 512                       # 256-aligned, amortizes per-step overhead
    if B8 >= 512:
        return 256
    # Small batch: split into (at least) two tiles so v7x's 2nd core has work.
    return max(8, _round_up(pl.cdiv(B8, 2), 8))


def _vmem_limit_bytes(weights, biases, tm, din_pad, out_pad):
    wb = sum(int(w.size) * w.dtype.itemsize for w in weights)   # single-buffered
    bb = sum(int(b.size) * b.dtype.itemsize for b in biases)
    max_w = max(w.shape[1] for w in weights)
    act = tm * (din_pad + out_pad) * 4 * 2          # x/out blocks, double-buffered
    inter = tm * max_w * 4 * 3                      # hidden activations / dot temps
    need = wb + bb + act + inter + (4 << 20)        # + headroom
    cap = _physical_vmem_bytes()
    return int(min(max(need, 16 << 20), int(cap * 0.8)))


# -------------------------------- JAX wrapper --------------------------------


def fused_mlp_forward(x, weights, biases, out_dim, *, tm=None,
                      matmul_dtype=jnp.bfloat16):
    """One pallas_call for the whole MLP; batch tiled over a parallel grid."""
    B, Din = x.shape
    Din_pad = weights[0].shape[0]
    assert Din <= Din_pad
    if Din_pad != Din:
        x = _pad_cols(x, Din_pad)                   # lane-dense x tile

    if tm is None:
        tm = _choose_tm(B)
    B_pad = _round_up(max(B, tm), tm)
    if B_pad // tm < 2:                             # keep both v7x cores busy
        B_pad = 2 * tm
    if B_pad != B:
        x = _pad_rows(x, B_pad)

    num_layers = len(weights)
    out_pad = weights[-1].shape[1]
    kernel = _make_fused_mlp_kernel(num_layers, matmul_dtype)
    vmem_bytes = _vmem_limit_bytes(weights, biases, tm, Din_pad, out_pad)

    flat_params = []
    for w, b in zip(weights, biases):
        flat_params += [w, b]

    wb = sum(int(w.size) * w.dtype.itemsize for w in weights)
    bb = sum(int(b.size) * b.dtype.itemsize for b in biases)
    cost = pl.CostEstimate(
        flops=2 * B_pad * sum(w.shape[0] * w.shape[1] for w in weights),
        transcendentals=0,
        bytes_accessed=B_pad * Din_pad * 4 + wb + bb + B_pad * out_pad * 4)

    def build(single_buffer_params):
        # Weights/biases have a constant index_map -> double-buffering them only
        # doubles their VMEM footprint; request a single buffer.
        pm = pl.Buffered(1) if single_buffer_params else None
        in_specs = [pl.BlockSpec((tm, Din_pad), lambda i: (i, 0))]  # x: batch-tiled
        for w, b in zip(weights, biases):
            in_specs.append(pl.BlockSpec(w.shape, lambda i: (0, 0), pipeline_mode=pm))
            in_specs.append(pl.BlockSpec(b.shape, lambda i: (0, 0), pipeline_mode=pm))
        return pl.pallas_call(
            kernel,
            out_shape=jax.ShapeDtypeStruct((B_pad, out_pad), jnp.float32),
            grid=(B_pad // tm,),
            in_specs=in_specs,
            out_specs=pl.BlockSpec((tm, out_pad), lambda i: (i, 0)),
            compiler_params=pltpu.CompilerParams(
                dimension_semantics=("parallel",),
                vmem_limit_bytes=vmem_bytes),
            cost_estimate=cost,
        )

    try:
        out = build(True)(x, *flat_params)
    except Exception:
        # Fallback: default (double) buffering if Buffered(1) is rejected.
        out = build(False)(x, *flat_params)
    return out[:B, :out_dim]


# ------------------------------ Pure-JAX reference ---------------------------


def simple_mlp_reference(x, hidden_params, head_params, eps=1e-5):
    h = x
    for p in hidden_params:
        y = h @ p["w"] + p["b"]
        y = (y - p["mean"]) / jnp.sqrt(p["var"] + eps) * p["gamma"] + p["beta"]
        h = jnp.maximum(y, 0.0)
    w_out, b_out = head_params
    return h @ w_out + b_out


# ---------------------------------- Main -------------------------------------


if __name__ == "__main__":
    key = jax.random.PRNGKey(0)
    batch = 8
    input_dim = 32
    hidden_dims = [64, 32]
    output_dim = 1

    key, kx, kp = jax.random.split(key, 3)
    x = jax.random.normal(kx, (batch, input_dim), jnp.float32)
    hidden_params, head_params = init_simple_mlp_params(
        kp, input_dim, hidden_dims, output_dim)

    weights, biases, out_dim = prepare_fused_params(
        input_dim, hidden_params, head_params)

    out = fused_mlp_forward(x, weights, biases, out_dim)
    out = jax.block_until_ready(out)

    ref = simple_mlp_reference(x, hidden_params, head_params)
    assert out.shape == (batch, output_dim), out.shape
    # Tolerance loosened vs pure-f32 because MXU inputs are bf16 (f32 accumulate).
    assert jnp.allclose(out, ref, atol=3e-2, rtol=3e-2), (
        f"mismatch vs reference: max abs err {jnp.max(jnp.abs(out - ref))}")

    print("KERNEL_OK")
</pallas_src>

<mosaic_0001>
module attributes {stable_mosaic.version = 11 : i64} {
  func.func @kernel(%arg0: i32, %arg1: memref<8x128xf32, #tpu.memory_space<vmem>>, %arg2: memref<128x128xbf16, #tpu.memory_space<vmem>>, %arg3: memref<1x128xf32, #tpu.memory_space<vmem>>, %arg4: memref<128x128xbf16, #tpu.memory_space<vmem>>, %arg5: memref<1x128xf32, #tpu.memory_space<vmem>>, %arg6: memref<128x128xbf16, #tpu.memory_space<vmem>>, %arg7: memref<1x128xf32, #tpu.memory_space<vmem>>, %arg8: memref<8x128xf32, #tpu.memory_space<vmem>>) attributes {dimension_semantics = [#tpu.dimension_semantics<parallel>], iteration_bounds = array<i64: 2>, scalar_prefetch = 0 : i64, scratch_operands = 0 : i64, tpu.core_type = #tpu.core_type<tc>, window_params = [{transform_indices = @transform_0, window_bounds = array<i64: 8, 128>}, {pipeline_mode = #tpu.pipeline_mode<synchronous>, transform_indices = @transform_1, window_bounds = array<i64: 128, 128>}, {pipeline_mode = #tpu.pipeline_mode<synchronous>, transform_indices = @transform_2, window_bounds = array<i64: 1, 128>}, {pipeline_mode = #tpu.pipeline_mode<synchronous>, transform_indices = @transform_3, window_bounds = array<i64: 128, 128>}, {pipeline_mode = #tpu.pipeline_mode<synchronous>, transform_indices = @transform_4, window_bounds = array<i64: 1, 128>}, {pipeline_mode = #tpu.pipeline_mode<synchronous>, transform_indices = @transform_5, window_bounds = array<i64: 128, 128>}, {pipeline_mode = #tpu.pipeline_mode<synchronous>, transform_indices = @transform_6, window_bounds = array<i64: 1, 128>}, {transform_indices = @transform_7, window_bounds = array<i64: 8, 128>}]} {
    %c0 = arith.constant 0 : index
    %c0_0 = arith.constant 0 : index
    %0 = vector.load %arg1[%c0, %c0_0] : memref<8x128xf32, #tpu.memory_space<vmem>>, vector<8x128xf32>
    %c0_1 = arith.constant 0 : index
    %c0_2 = arith.constant 0 : index
    %1 = vector.load %arg2[%c0_1, %c0_2] : memref<128x128xbf16, #tpu.memory_space<vmem>>, vector<128x128xbf16>
    %c0_3 = arith.constant 0 : index
    %c0_4 = arith.constant 0 : index
    %2 = vector.load %arg3[%c0_3, %c0_4] : memref<1x128xf32, #tpu.memory_space<vmem>>, vector<1x128xf32>
    %3 = arith.truncf %0 : vector<8x128xf32> to vector<8x128xbf16>
    %cst = arith.constant dense<0.000000e+00> : vector<8x128xf32>
    %4 = tpu.matmul %3, %1, %cst {dimension_numbers = #tpu.dot_dimension_numbers<[1], [0], [0], [1], [0, 0, 1, 1], [], []>} : vector<8x128xbf16>, vector<128x128xbf16>, vector<8x128xf32> -> vector<8x128xf32>
    %5 = vector.broadcast %2 : vector<1x128xf32> to vector<8x128xf32>
    %6 = arith.addf %4, %5 : vector<8x128xf32>
    %cst_5 = arith.constant 0.000000e+00 : f32
    %7 = vector.broadcast %cst_5 : f32 to vector<8x128xf32>
    %8 = arith.maximumf %6, %7 : vector<8x128xf32>
    %c0_6 = arith.constant 0 : index
    %c0_7 = arith.constant 0 : index
    %9 = vector.load %arg4[%c0_6, %c0_7] : memref<128x128xbf16, #tpu.memory_space<vmem>>, vector<128x128xbf16>
    %c0_8 = arith.constant 0 : index
    %c0_9 = arith.constant 0 : index
    %10 = vector.load %arg5[%c0_8, %c0_9] : memref<1x128xf32, #tpu.memory_space<vmem>>, vector<1x128xf32>
    %11 = arith.truncf %8 : vector<8x128xf32> to vector<8x128xbf16>
    %cst_10 = arith.constant dense<0.000000e+00> : vector<8x128xf32>
    %12 = tpu.matmul %11, %9, %cst_10 {dimension_numbers = #tpu.dot_dimension_numbers<[1], [0], [0], [1], [0, 0, 1, 1], [], []>} : vector<8x128xbf16>, vector<128x128xbf16>, vector<8x128xf32> -> vector<8x128xf32>
    %13 = vector.broadcast %10 : vector<1x128xf32> to vector<8x128xf32>
    %14 = arith.addf %12, %13 : vector<8x128xf32>
    %cst_11 = arith.constant 0.000000e+00 : f32
    %15 = vector.broadcast %cst_11 : f32 to vector<8x128xf32>
    %16 = arith.maximumf %14, %15 : vector<8x128xf32>
    %c0_12 = arith.constant 0 : index
    %c0_13 = arith.constant 0 : index
    %17 = vector.load %arg6[%c0_12, %c0_13] : memref<128x128xbf16, #tpu.memory_space<vmem>>, vector<128x128xbf16>
    %c0_14 = arith.constant 0 : index
    %c0_15 = arith.constant 0 : index
    %18 = vector.load %arg7[%c0_14, %c0_15] : memref<1x128xf32, #tpu.memory_space<vmem>>, vector<1x128xf32>
    %19 = arith.truncf %16 : vector<8x128xf32> to vector<8x128xbf16>
    %cst_16 = arith.constant dense<0.000000e+00> : vector<8x128xf32>
    %20 = tpu.matmul %19, %17, %cst_16 {dimension_numbers = #tpu.dot_dimension_numbers<[1], [0], [0], [1], [0, 0, 1, 1], [], []>} : vector<8x128xbf16>, vector<128x128xbf16>, vector<8x128xf32> -> vector<8x128xf32>
    %21 = vector.broadcast %18 : vector<1x128xf32> to vector<8x128xf32>
    %22 = arith.addf %20, %21 : vector<8x128xf32>
    %c0_17 = arith.constant 0 : index
    %c0_18 = arith.constant 0 : index
    %23 = vector.load %arg8[%c0_17, %c0_18] : memref<8x128xf32, #tpu.memory_space<vmem>>, vector<8x128xf32>
    tpu.vector_store %arg8[%c0_17, %c0_18], %22 {strides = array<i32>} : memref<8x128xf32, #tpu.memory_space<vmem>>, vector<8x128xf32>,
    return
  }
  func.func @transform_0(%arg0: i32) -> (i32, i32) {
    %c0_i32 = arith.constant 0 : i32
    %c0_i32_0 = arith.constant 0 : i32
    return %arg0, %c0_i32 : i32, i32
  }
  func.func @transform_1(%arg0: i32) -> (i32, i32) {
    %c0_i32 = arith.constant 0 : i32
    %c0_i32_0 = arith.constant 0 : i32
    %c0_i32_1 = arith.constant 0 : i32
    return %c0_i32, %c0_i32_0 : i32, i32
  }
  func.func @transform_2(%arg0: i32) -> (i32, i32) {
    %c0_i32 = arith.constant 0 : i32
    %c0_i32_0 = arith.constant 0 : i32
    %c0_i32_1 = arith.constant 0 : i32
    return %c0_i32, %c0_i32_0 : i32, i32
  }
  func.func @transform_3(%arg0: i32) -> (i32, i32) {
    %c0_i32 = arith.constant 0 : i32
    %c0_i32_0 = arith.constant 0 : i32
    %c0_i32_1 = arith.constant 0 : i32
    return %c0_i32, %c0_i32_0 : i32, i32
  }
  func.func @transform_4(%arg0: i32) -> (i32, i32) {
    %c0_i32 = arith.constant 0 : i32
    %c0_i32_0 = arith.constant 0 : i32
    %c0_i32_1 = arith.constant 0 : i32
    return %c0_i32, %c0_i32_0 : i32, i32
  }
  func.func @transform_5(%arg0: i32) -> (i32, i32) {
    %c0_i32 = arith.constant 0 : i32
    %c0_i32_0 = arith.constant 0 : i32
    %c0_i32_1 = arith.constant 0 : i32
    return %c0_i32, %c0_i32_0 : i32, i32
  }
  func.func @transform_6(%arg0: i32) -> (i32, i32) {
    %c0_i32 = arith.constant 0 : i32
    %c0_i32_0 = arith.constant 0 : i32
    %c0_i32_1 = arith.constant 0 : i32
    return %c0_i32, %c0_i32_0 : i32, i32
  }
  func.func @transform_7(%arg0: i32) -> (i32, i32) {
    %c0_i32 = arith.constant 0 : i32
    %c0_i32_0 = arith.constant 0 : i32
    return %arg0, %c0_i32 : i32, i32
  }
}

module attributes {stable_mosaic.version = 11 : i64} {
  func.func @kernel(%arg0: i32, %arg1: memref<8x128xf32, #tpu.memory_space<vmem>>, %arg2: memref<128x128xbf16, #tpu.memory_space<vmem>>, %arg3: memref<1x128xf32, #tpu.memory_space<vmem>>, %arg4: memref<128x128xbf16, #tpu.memory_space<vmem>>, %arg5: memref<1x128xf32, #tpu.memory_space<vmem>>, %arg6: memref<128x128xbf16, #tpu.memory_space<vmem>>, %arg7: memref<1x128xf32, #tpu.memory_space<vmem>>, %arg8: memref<8x128xf32, #tpu.memory_space<vmem>>) attributes {dimension_semantics = [#tpu.dimension_semantics<parallel>], iteration_bounds = array<i64: 2>, scalar_prefetch = 0 : i64, scratch_operands = 0 : i64, tpu.core_type = #tpu.core_type<tc>, window_params = [{transform_indices = @transform_0, window_bounds = array<i64: 8, 128>}, {pipeline_mode = #tpu.pipeline_mode<synchronous>, transform_indices = @transform_1, window_bounds = array<i64: 128, 128>}, {pipeline_mode = #tpu.pipeline_mode<synchronous>, transform_indices = @transform_2, window_bounds = array<i64: 1, 128>}, {pipeline_mode = #tpu.pipeline_mode<synchronous>, transform_indices = @transform_3, window_bounds = array<i64: 128, 128>}, {pipeline_mode = #tpu.pipeline_mode<synchronous>, transform_indices = @transform_4, window_bounds = array<i64: 1, 128>}, {pipeline_mode = #tpu.pipeline_mode<synchronous>, transform_indices = @transform_5, window_bounds = array<i64: 128, 128>}, {pipeline_mode = #tpu.pipeline_mode<synchronous>, transform_indices = @transform_6, window_bounds = array<i64: 1, 128>}, {transform_indices = @transform_7, window_bounds = array<i64: 8, 128>}]} {
    %c0 = arith.constant 0 : index
    %c0_0 = arith.constant 0 : index
    %0 = vector.load %arg1[%c0, %c0_0] : memref<8x128xf32, #tpu.memory_space<vmem>>, vector<8x128xf32>
    %c0_1 = arith.constant 0 : index
    %c0_2 = arith.constant 0 : index
    %1 = vector.load %arg2[%c0_1, %c0_2] : memref<128x128xbf16, #tpu.memory_space<vmem>>, vector<128x128xbf16>
    %c0_3 = arith.constant 0 : index
    %c0_4 = arith.constant 0 : index
    %2 = vector.load %arg3[%c0_3, %c0_4] : memref<1x128xf32, #tpu.memory_space<vmem>>, vector<1x128xf32>
    %3 = arith.truncf %0 : vector<8x128xf32> to vector<8x128xbf16>
    %cst = arith.constant dense<0.000000e+00> : vector<8x128xf32>
    %4 = tpu.matmul %3, %1, %cst {dimension_numbers = #tpu.dot_dimension_numbers<[1], [0], [0], [1], [0, 0, 1, 1], [], []>} : vector<8x128xbf16>, vector<128x128xbf16>, vector<8x128xf32> -> vector<8x128xf32>
    %5 = vector.broadcast %2 : vector<1x128xf32> to vector<8x128xf32>
    %6 = arith.addf %4, %5 : vector<8x128xf32>
    %cst_5 = arith.constant 0.000000e+00 : f32
    %7 = vector.broadcast %cst_5 : f32 to vector<8x128xf32>
    %8 = arith.maximumf %6, %7 : vector<8x128xf32>
    %c0_6 = arith.constant 0 : index
    %c0_7 = arith.constant 0 : index
    %9 = vector.load %arg4[%c0_6, %c0_7] : memref<128x128xbf16, #tpu.memory_space<vmem>>, vector<128x128xbf16>
    %c0_8 = arith.constant 0 : index
    %c0_9 = arith.constant 0 : index
    %10 = vector.load %arg5[%c0_8, %c0_9] : memref<1x128xf32, #tpu.memory_space<vmem>>, vector<1x128xf32>
    %11 = arith.truncf %8 : vector<8x128xf32> to vector<8x128xbf16>
    %cst_10 = arith.constant dense<0.000000e+00> : vector<8x128xf32>
    %12 = tpu.matmul %11, %9, %cst_10 {dimension_numbers = #tpu.dot_dimension_numbers<[1], [0], [0], [1], [0, 0, 1, 1], [], []>} : vector<8x128xbf16>, vector<128x128xbf16>, vector<8x128xf32> -> vector<8x128xf32>
    %13 = vector.broadcast %10 : vector<1x128xf32> to vector<8x128xf32>
    %14 = arith.addf %12, %13 : vector<8x128xf32>
    %cst_11 = arith.constant 0.000000e+00 : f32
    %15 = vector.broadcast %cst_11 : f32 to vector<8x128xf32>
    %16 = arith.maximumf %14, %15 : vector<8x128xf32>
    %c0_12 = arith.constant 0 : index
    %c0_13 = arith.constant 0 : index
    %17 = vector.load %arg6[%c0_12, %c0_13] : memref<128x128xbf16, #tpu.memory_space<vmem>>, vector<128x128xbf16>
    %c0_14 = arith.constant 0 : index
    %c0_15 = arith.constant 0 : index
    %18 = vector.load %arg7[%c0_14, %c0_15] : memref<1x128xf32, #tpu.memory_space<vmem>>, vector<1x128xf32>
    %19 = arith.truncf %16 : vector<8x128xf32> to vector<8x128xbf16>
    %cst_16 = arith.constant dense<0.000000e+00> : vector<8x128xf32>
    %20 = tpu.matmul %19, %17, %cst_16 {dimension_numbers = #tpu.dot_dimension_numbers<[1], [0], [0], [1], [0, 0, 1, 1], [], []>} : vector<8x128xbf16>, vector<128x128xbf16>, vector<8x128xf32> -> vector<8x128xf32>
    %21 = vector.broadcast %18 : vector<1x128xf32> to vector<8x128xf32>
    %22 = arith.addf %20, %21 : vector<8x128xf32>
    %c0_17 = arith.constant 0 : index
    %c0_18 = arith.constant 0 : index
    %23 = vector.load %arg8[%c0_17, %c0_18] : memref<8x128xf32, #tpu.memory_space<vmem>>, vector<8x128xf32>
    tpu.vector_store %arg8[%c0_17, %c0_18], %22 {strides = array<i32>} : memref<8x128xf32, #tpu.memory_space<vmem>>, vector<8x128xf32>,
    return
  }
  func.func @transform_0(%arg0: i32) -> (i32, i32) {
    %c0_i32 = arith.constant 0 : i32
    %c0_i32_0 = arith.constant 0 : i32
    return %arg0, %c0_i32 : i32, i32
  }
  func.func @transform_1(%arg0: i32) -> (i32, i32) {
    %c0_i32 = arith.constant 0 : i32
    %c0_i32_0 = arith.constant 0 : i32
    %c0_i32_1 = arith.constant 0 : i32
    return %c0_i32, %c0_i32_0 : i32, i32
  }
  func.func @transform_2(%arg0: i32) -> (i32, i32) {
    %c0_i32 = arith.constant 0 : i32
    %c0_i32_0 = arith.constant 0 : i32
    %c0_i32_1 = arith.constant 0 : i32
    return %c0_i32, %c0_i32_0 : i32, i32
  }
  func.func @transform_3(%arg0: i32) -> (i32, i32) {
    %c0_i32 = arith.constant 0 : i32
    %c0_i32_0 = arith.constant 0 : i32
    %c0_i32_1 = arith.constant 0 : i32
    return %c0_i32, %c0_i32_0 : i32, i32
  }
  func.func @transform_4(%arg0: i32) -> (i32, i32) {
    %c0_i32 = arith.constant 0 : i32
    %c0_i32_0 = arith.constant 0 : i32
    %c0_i32_1 = arith.constant 0 : i32
    return %c0_i32, %c0_i32_0 : i32, i32
  }
  func.func @transform_5(%arg0: i32) -> (i32, i32) {
    %c0_i32 = arith.constant 0 : i32
    %c0_i32_0 = arith.constant 0 : i32
    %c0_i32_1 = arith.constant 0 : i32
    return %c0_i32, %c0_i32_0 : i32, i32
  }
  func.func @transform_6(%arg0: i32) -> (i32, i32) {
    %c0_i32 = arith.constant 0 : i32
    %c0_i32_0 = arith.constant 0 : i32
    %c0_i32_1 = arith.constant 0 : i32
    return %c0_i32, %c0_i32_0 : i32, i32
  }
  func.func @transform_7(%arg0: i32) -> (i32, i32) {
    %c0_i32 = arith.constant 0 : i32
    %c0_i32_0 = arith.constant 0 : i32
    return %arg0, %c0_i32 : i32, i32
  }
}

</mosaic_0001>

<bundles_post_ra>
// kernel: tpu_custom_call.1
= control target key start
LH: loop header
LB: loop body
LE: loop exit
PB: predicated region body
PF: predicated region fallthrough
CT: control target
= control target key end

     0   :  { %12 = vsyncpa [#allocation3], 0  ;;  %s1577_s0 = inlined_call_operand.hbm [shape: f32[16,128], index: 0, kind: input, shape index: {}]   ;;  %s1578_s1 = inlined_call_operand.hbm [shape: bf16[128,128], index: 1, kind: input, shape index: {}]   ;;  %s1579_s2 = inlined_call_operand.vmem [shape: f32[1,128], index: 2, kind: input, shape index: {}]   ;;  %s1580_s3 = inlined_call_operand.hbm [shape: bf16[128,128], index: 3, kind: input, shape index: {}]   ;;  %s1581_s4 = inlined_call_operand.vmem [shape: f32[1,128], index: 4, kind: input, shape index: {}]   ;;  %s1582_s5 = inlined_call_operand.hbm [shape: bf16[128,128], index: 5, kind: input, shape index: {}]   ;;  %s1583_s6 = inlined_call_operand.vmem [shape: f32[1,128], index: 6, kind: input, shape index: {}]   ;;  %s1584_s7 = inlined_call_operand.hbm [shape: f32[16,128], index: 7, kind: output, shape index: {}]  }
   0x1   :  { %14 = vsyncpa [#allocation3 + $0x1], 0 }
   0x2   :  { %15 = vsyncpa [#allocation6], 0 }
   0x3   :  { %16 = vsyncpa [#allocation9], 0 }
   0x4   :  { %17 = vsyncpa [#allocation4], 0 }
   0x5   :  { %19 = vsyncpa [#allocation4 + $0x1], 0  ;;  %s1268_s24 = smov 0   ;;  %s1270_s25 = smov 0  }
   0x6   :  { %s1272_s26 = smov 0   ;;  %s1274_s27 = smov 0  }
   0x7 LB: > { %s1289_s28 = sadd.s32 4294967295, %s1217_s27   ;;  %s792_s29 = sadd.s32 4294967294, %s1217_s27   ;;  %s1217_s27 = sphi %s1274_s27, %s1610_s27   ;;  %s1213_s26 = sphi %s1272_s26, %s1609_s26   ;;  %s1209_s25 = sphi %s1270_s25, %s1608_s25   ;;  %s1205_s24 = sphi %s1268_s24, %s1607_s24  }
   0x8   : > { %p45_p0 = scmp.ne.s32.totalorder %s1209_s25, %s1205_s24  ;;  %p1585_p1 = scmp.eq.s32.totalorder %s1289_s28, 0 }
   0x9   : > { %p201_p3 = scmp.eq.s32.totalorder %s792_s29, 1  ;;  %p793_p5 = scmp.ge.s32.totalorder %s1217_s27, 1 }
   0xa   : > { %p1298_p4 = por %p1585_p1, %p45_p0  ;;  %p208_p7 = scmp.lt.s32.totalorder %s1217_s27, 3 }
   0xb   : > { %p1303_p6 = por %p201_p3, %p45_p0  ;;  %s1219_s10 = smov [#allocation5]  }
   0xc   : > { %s1589_s30 = scalar_select %p1298_p4, 1, 0 }
   0xd   : > { %s1590_s8 = scalar_select %p1303_p6, 1, 0 }
   0xe   : > { %p1308_p8 = pnand %p793_p5, %p208_p7  ;;  %s220_s11 = sshll.u32 %s1219_s10, 4  ;;  %s1312_s11 = int_to_ptr.vmem [resolvable:$true] %s220_s11 }
   0xf   : > { %1591 = sst [smem:[#allocation15_spill]] %s1590_s8  ;;  %s1220_s13 = smov [#allocation7]  }
  0x10   : > { %s1592_s9 = scalar_select %p1308_p8, 1, 0 }
  0x11   : > { %p940_p9 = pneg %p1308_p8  ;;  %s236_s14 = sshll.u32 %s1220_s13, 4  ;;  %s1323_s14 = int_to_ptr.vmem [resolvable:$true] %s236_s14 }
  0x12   : > { %s1221_s15 = smov [#allocation8]   ;;  %s1029_s19 = scalar_lea.hbm %s1578_s1, 1024 }
  0x13   : > { %p1319_p11 = pnand %p940_p9, %p1585_p1  ;;  %s1325_s16 = sshll.u32 %s1221_s15, 4  ;;  %s253_s16 = int_to_ptr.vmem [resolvable:$true] %s1325_s16 }
  0x14   : > { %p1030_p12 = scmp.ne.s32.totalorder %s1578_s1, %s1029_s19  ;;  %p1036_p5 = scmp.lt.u32.totalorder %s1029_s19, %s1578_s1 }
  0x15   : > { %p1335_p13 = pneg %p1319_p11 }
  0x17   : > { %p1032_p0 = pnand %p1335_p13, %p1030_p12 }
  0x19   : > { %p1033_p3 = pneg %p1032_p0 }
  0x1b   : > { %p1038_p7 = pnand %p1036_p5, %p1033_p3 }
  0x1d   : > { %1041 = shalt.err (!%p1038_p7)
}
  0x1e   : > { %s1042_s10 = scalar_lea.vmem %s1312_s11, 1024  ;;  %p1050_p2 = scmp.lt.s32.totalorder %s1312_s11, %s1312_s11 }
  0x1f   : > { %p1043_p9 = scmp.ne.s32.totalorder %s1312_s11, %s1042_s10  ;;  %p1051_p6 = scmp.lt.s32.totalorder %s1042_s10, %s1042_s10 }
  0x21   : > { %p1045_p10 = pnand %p1043_p9, %p1335_p13  ;;  %p1052_p12 = por %p1051_p6, %p1050_p2 }
  0x23   : > { %p1046_p1 = pneg %p1045_p10 }
  0x25   : > { %p1053_p0 = pnand %p1052_p12, %p1046_p1 }
  0x27   : > { %1056 = shalt.err (!%p1053_p0)
}
  0x28   : > { %s1222_s13 = smov 64   ;;  %s1223_s15 = smov 4  }
  0x29   : > { %943 = dma.hbm_to_vmem [thread:$0]  (!%p1319_p11), %s1578_s1, 1024, %s1312_s11, [#allocation6], %s1222_s13, %s1222_s13, %s1223_s15  }
  0x2a   : > { %s1057_s21 = scalar_lea.hbm %s1580_s3, 1024 }
  0x2b   : > { %p1058_p1 = scmp.ne.s32.totalorder %s1580_s3, %s1057_s21  ;;  %p1064_p10 = scmp.lt.u32.totalorder %s1057_s21, %s1580_s3 }
  0x2d   : > { %p1060_p2 = pnand %p1058_p1, %p1335_p13 }
  0x2f   : > { %p1061_p6 = pneg %p1060_p2 }
  0x31   : > { %p1066_p3 = pnand %p1064_p10, %p1061_p6 }
  0x33   : > { %1069 = shalt.err (!%p1066_p3)
}
  0x34   : > { %s1070_s11 = scalar_lea.vmem %s1323_s14, 1024  ;;  %p1078_p12 = scmp.lt.s32.totalorder %s1323_s14, %s1323_s14 }
  0x35   : > { %p1071_p5 = scmp.ne.s32.totalorder %s1323_s14, %s1070_s11  ;;  %p1079_p0 = scmp.lt.s32.totalorder %s1070_s11, %s1070_s11 }
  0x37   : > { %p1073_p7 = pnand %p1071_p5, %p1335_p13  ;;  %p1080_p1 = por %p1079_p0, %p1078_p12 }
  0x39   : > { %p1074_p9 = pneg %p1073_p7 }
  0x3b   : > { %p1081_p2 = pnand %p1080_p1, %p1074_p9 }
  0x3d   : > { %1084 = shalt.err (!%p1081_p2)
}
  0x3e   : > { %946 = dma.hbm_to_vmem [thread:$0]  (!%p1319_p11), %s1580_s3, 1024, %s1323_s14, [#allocation6], %s1222_s13, %s1222_s13, %s1223_s15  }
  0x3f   : > { %s1085_s20 = scalar_lea.hbm %s1582_s5, 1024 }
  0x40   : > { %p1086_p6 = scmp.ne.s32.totalorder %s1582_s5, %s1085_s20  ;;  %p1092_p5 = scmp.lt.u32.totalorder %s1085_s20, %s1582_s5 }
  0x42   : > { %p1088_p10 = pnand %p1086_p6, %p1335_p13 }
  0x44   : > { %p1089_p3 = pneg %p1088_p10 }
  0x46   : > { %p1094_p7 = pnand %p1092_p5, %p1089_p3 }
  0x48   : > { %1097 = shalt.err (!%p1094_p7)
}
  0x49   : > { %s1098_s11 = scalar_lea.vmem %s253_s16, 1024  ;;  %p1106_p1 = scmp.lt.s32.totalorder %s253_s16, %s253_s16 }
  0x4a   : > { %p1099_p9 = scmp.ne.s32.totalorder %s253_s16, %s1098_s11  ;;  %p1107_p2 = scmp.lt.s32.totalorder %s1098_s11, %s1098_s11 }
  0x4c   : > { %p1101_p12 = pnand %p1099_p9, %p1335_p13  ;;  %p1108_p4 = por %p1107_p2, %p1106_p1 }
  0x4e   : > { %p1102_p0 = pneg %p1101_p12 }
  0x50   : > { %p1109_p8 = pnand %p1108_p4, %p1102_p0 }
  0x52   : > { %1112 = shalt.err (!%p1109_p8)
}
  0x53   : > { %949 = dma.hbm_to_vmem [thread:$0]  (!%p1319_p11), %s1582_s5, 1024, %s253_s16, [#allocation9], %s1222_s13, %s1222_s13, %s1223_s15  }
  0x54   : > { %s1408_s22 = sadd.s32 1, %s1217_s27   ;;  %s32_s17 = sadd.s32 1, %s1213_s26 }
  0x55   : > { %s29_s12 = ssub.s32 %s1217_s27, %s1408_s22  ;;  %p39_p8 = scmp.ne.s32.totalorder %s1213_s26, %s1209_s25 }
  0x56   : > { %p30_p4 = scmp.eq.s32.totalorder %s29_s12, 0  ;;  %p40_p13 = scmp.eq.s32.totalorder %s1217_s27, 0 }
  0x57   : > { %p961_p6 = scmp.lt.s32.totalorder %s1217_s27, 2  ;;  %p1595_p3 = scmp.eq.s32.totalorder %s1289_s28, 1 }
  0x58   : > { %s1418_s18 = scalar_select %p30_p4, %s1213_s26, %s32_s17  }
  0x59   : > { %p41_p10 = por %p40_p13, %p39_p8  ;;  %p1422_p5 = por %p1595_p3, %p39_p8 }
  0x5a   : > { %s269_s20 = sand.u32 1, %s1213_s26   ;;  %s799_s21 = sshll.u32 %s1217_s27, 7 }
  0x5b   : > { %s798_s16 = sshll.u32 %s269_s20, 3  ;;  %s1431_s23 = scalar_lea.hbm %s1577_s0, %s799_s21 }
  0x5c   : > { %s273_s29 = scalar_lea.vmem [#allocation2], %s798_s16  ;;  %p1433_p11 = pnand %p961_p6, %p41_p10 }
  0x5d   : > { %s280_s10 = sshll.u32 %s273_s29, 4  ;;  %s270_s14 = scalar_lea.sflag [#allocation3], %s269_s20  ;;  %s1437_s10 = int_to_ptr.vmem [resolvable:$true] %s280_s10 }
  0x5e   : > { %s1113_s8 = scalar_lea.hbm %s1431_s23, 128  ;;  %p1115_p9 = pneg %p1433_p11 }
  0x5f   : > { %p1114_p7 = scmp.ne.s32.totalorder %s1431_s23, %s1113_s8  ;;  %s1118_s21 = scalar_lea.hbm %s1577_s0, 256 }
  0x60   : > { %p1119_p1 = scmp.lt.u32.totalorder %s1431_s23, %s1577_s0  ;;  %p1120_p2 = scmp.lt.u32.totalorder %s1118_s21, %s1113_s8 }
  0x61   : > { %p1116_p12 = pnand %p1115_p9, %p1114_p7  ;;  %p1122_p8 = scmp.lt.u32.totalorder %s1113_s8, %s1431_s23 }
  0x62   : > { %p1121_p4 = por %p1120_p2, %p1119_p1 }
  0x63   : > { %p1117_p0 = pneg %p1116_p12 }
  0x64   : > { %p1123_p13 = por %p1122_p8, %p1121_p4 }
  0x66   : > { %p1124_p6 = pnand %p1123_p13, %p1117_p0 }
  0x68   : > { %1127 = shalt.err (!%p1124_p6)
}
  0x69   : > { %s1128_s20 = scalar_lea.vmem %s1437_s10, 128  ;;  %s1224_s15 = smov [#allocation2]  }
  0x6a   : > { %p1129_p10 = scmp.ne.s32.totalorder %s1437_s10, %s1128_s20  ;;  %s1133_s29 = sshll.u32 %s1224_s15, 4  ;;  %s1134_s29 = int_to_ptr.vmem [resolvable:$false] %s1133_s29 }
  0x6b   : > { %s1135_s12 = scalar_lea.vmem %s1134_s29, 256  ;;  %p1136_p12 = scmp.lt.s32.totalorder %s1437_s10, %s1134_s29 }
  0x6c   : > { %p1131_p3 = pnand %p1129_p10, %p1115_p9  ;;  %p1137_p1 = scmp.lt.s32.totalorder %s1135_s12, %s1128_s20 }
  0x6e   : > { %p1132_p7 = pneg %p1131_p3  ;;  %p1138_p2 = por %p1137_p1, %p1136_p12 }
  0x70   : > { %p1139_p4 = pnand %p1138_p2, %p1132_p7 }
  0x72   : > { %1142 = shalt.err (!%p1139_p4)
}
  0x73   : > { %953 = dma.hbm_to_vmem [thread:$0]  (!%p1433_p11), %s1431_s23, 128, %s1437_s10, %s270_s14  }
  0x74   : > { %p1598_p0 = scmp.ne.s32.totalorder %s1592_s9, 0 }
  0x75   : > { %s1467_s8 = sand.u32 (!%p1598_p0), 1, %s1209_s25   ;;  %p1599_p9 = scmp.ne.s32.totalorder (!%p1598_p0), %s1589_s30, 0 }
  0x76   : > { %289 = sbr.rel (%p1598_p0) target bundleno = 831 (0x33f), region = 48  ;;  %s801_s17 = sshll.u32 (!%p1598_p0), %s1467_s8, 3 }
  0x77   : > { %s292_s21 = scalar_lea.sflag (!%p1598_p0), [#allocation3], %s1467_s8  ;;  %s1473_s16 = scalar_lea.vmem (!%p1598_p0), [#allocation2], %s801_s17 }
  0x7d   : > { %1188 = dma.done.wait (%p1599_p9), %s292_s21, 128  }
  0x7e   : > { %1190 = vsyncadd (%p1599_p9), %s292_s21, 4294967168  ;;  %p1600_p11 = scmp.eq.s32.totalorder %s1289_s28, 0 }
  0x80   : > { %1192 = dma.done.wait (%p1600_p11), [#allocation6], 2048   ;;  %p1601_p8 = pmov %p1600_p11 }
  0x82   : > { %1194 = vsyncadd (%p1601_p8), [#allocation6], 4294965248  ;;  %p1602_p13 = pmov %p1601_p8 }
  0x83   : > { %p1603_p6 = pmov %p1601_p8 }
  0x84   : > { %1196 = dma.done.wait (%p1602_p13), [#allocation9], 1024  }
  0x85   : > { %1198 = vsyncadd (%p1603_p6), [#allocation9], 4294966272  ;;  %v1225_v0 = vmov 0.0   ;;  %vm1226_vm0 = vmmov 0   ;;  %v1005_v1 = vld [vmem:[#allocation5] sm:$0xff]   ;;  %v1006_v2 = vld [vmem:[#allocation5 + $0x8] sm:$0xff]  }
  0x86   : > { %864 = vmatprep.subr.bf16.mxu0 %v1225_v0  ;;  %880 = vmatprep.mubr.msk.bf16.mxu0 %vm1226_vm0, %v1225_v0  ;;  %v1007_v3 = vld [vmem:[#allocation5 + $0x10] sm:$0xff]   ;;  %v1013_v4 = vld [vmem:[#allocation7] sm:$0xff]   ;;  %v1008_v5 = vld [vmem:[#allocation5 + $0x18] sm:$0xff]   ;;  %s834_s13 = sshll.u32 %s1289_s28, 7  ;;  %s337_s20 = scalar_lea.vmem [#allocation10], %s801_s17 }
  0x87   : > { %884 = vmatprep.subr.bf16.mxu1 %v1225_v0  ;;  %900 = vmatprep.mubr.msk.bf16.mxu1 %vm1226_vm0, %v1225_v0  ;;  %v1014_v6 = vld [vmem:[#allocation7 + $0x8] sm:$0xff]   ;;  %v1009_v7 = vld [vmem:[#allocation5 + $0x20] sm:$0xff]   ;;  %v1015_v8 = vld [vmem:[#allocation7 + $0x10] sm:$0xff]   ;;  %s693_s15 = sshll.u32 %s337_s20, 4  ;;  %s1533_s21 = scalar_lea.hbm %s1584_s7, %s834_s13  ;;  %s1535_s15 = int_to_ptr.vmem [resolvable:$true] %s693_s15 }
  0x88   : > { %865 = vmatpush3.bf16.msra.mxu0 %v1005_v1  ;;  %885 = vmatpush3.bf16.msra.mxu1 %v1013_v4  ;;  %v1010_v9 = vld [vmem:[#allocation5 + $0x28] sm:$0xff]   ;;  %v1016_v10 = vld [vmem:[#allocation7 + $0x18] sm:$0xff]   ;;  %v1011_v11 = vld [vmem:[#allocation5 + $0x30] sm:$0xff]   ;;  %s680_s28 = scalar_lea.sflag [#allocation4], %s1467_s8  ;;  %s1227_s17 = smov [#allocation10]  }
  0x89   : > { %866 = vmatprep.subr.bf16.mxu0 %v1225_v0  ;;  %886 = vmatprep.subr.bf16.mxu1 %v1225_v0  ;;  %v1017_v12 = vld [vmem:[#allocation7 + $0x20] sm:$0xff]   ;;  %v1012_v13 = vld [vmem:[#allocation5 + $0x38] sm:$0xff]   ;;  %v1018_v15 = vld [vmem:[#allocation7 + $0x28] sm:$0xff]   ;;  %s1147_s30 = sshll.u32 %s1227_s17, 4  ;;  %s1148_s30 = int_to_ptr.vmem [resolvable:$false] %s1147_s30 }
  0x8a   : > { %v339_v14 = vld [vmem:[%s1473_s16] sm:$0xff]  ;;  %v1021_v19 = vld [vmem:[#allocation8] sm:$0xff]   ;;  %v1022_v20 = vld [vmem:[#allocation8 + $0x8] sm:$0xff]   ;;  %s1143_s16 = scalar_lea.vmem %s1535_s15, 128  ;;  %s1149_s9 = scalar_lea.vmem %s1148_s30, 256 }
  0x8b   : > { %v357_v16 = vpack.c.bf16 %v339_v14, %v339_v14  ;;  %v1019_v17 = vld [vmem:[#allocation7 + $0x30] sm:$0xff]   ;;  %v1020_v18 = vld [vmem:[#allocation7 + $0x38] sm:$0xff]   ;;  %v1025_v23 = vld [vmem:[#allocation8 + $0x20] sm:$0xff]   ;;  %p1144_p10 = scmp.ne.s32.totalorder %s1535_s15, %s1143_s16  ;;  %p1150_p12 = scmp.lt.s32.totalorder %s1535_s15, %s1148_s30 }
  0x8c   : > { %867 = vmatpush3.bf16.msra.mxu0 %v1006_v2  ;;  %887 = vmatpush3.bf16.msra.mxu1 %v1014_v6  ;;  %v1023_v21 = vld [vmem:[#allocation8 + $0x10] sm:$0xff]   ;;  %v1024_v22 = vld [vmem:[#allocation8 + $0x18] sm:$0xff]   ;;  %v1026_v24 = vld [vmem:[#allocation8 + $0x28] sm:$0xff]   ;;  %p1151_p1 = scmp.lt.s32.totalorder %s1149_s9, %s1143_s16 }
  0x8d   : > { %868 = vmatprep.subr.bf16.mxu0 %v1225_v0  ;;  %888 = vmatprep.subr.bf16.mxu1 %v1225_v0  ;;  %v806_v25 = vld [vmem:[%s1579_s2] ss:$0 sm:$0xff]  ;;  %v1028_v34 = vld [vmem:[#allocation8 + $0x38] sm:$0xff]   ;;  %p1145_p3 = pnand %p1144_p10, %p1422_p5 }
  0x8e   : > { %v1027_v33 = vld [vmem:[#allocation8 + $0x30] sm:$0xff]   ;;  %p1152_p2 = por %p1151_p1, %p1150_p12 }
  0x8f   : > { %v815_v35 = vld [vmem:[%s1581_s4] ss:$0 sm:$0xff]  ;;  %p1146_p7 = pneg %p1145_p3 }
  0x90   : > { %869 = vmatpush3.bf16.msra.mxu0 %v1007_v3  ;;  %889 = vmatpush3.bf16.msra.mxu1 %v1015_v8  ;;  %v824_v43 = vld [vmem:[%s1583_s6] ss:$0 sm:$0xff] }
  0x91   : > { %870 = vmatprep.subr.bf16.mxu0 %v1225_v0  ;;  %890 = vmatprep.subr.bf16.mxu1 %v1225_v0  ;;  %p1153_p4 = pnand %p1152_p2, %p1146_p7 }
  0x94   : > { %871 = vmatpush3.bf16.msra.mxu0 %v1008_v5  ;;  %891 = vmatpush3.bf16.msra.mxu1 %v1016_v10 }
  0x95   : > { %872 = vmatprep.subr.bf16.mxu0 %v1225_v0  ;;  %892 = vmatprep.subr.bf16.mxu1 %v1225_v0 }
  0x98   : > { %873 = vmatpush3.bf16.msra.mxu0 %v1009_v7  ;;  %893 = vmatpush3.bf16.msra.mxu1 %v1017_v12 }
  0x99   : > { %874 = vmatprep.subr.bf16.mxu0 %v1225_v0  ;;  %894 = vmatprep.subr.bf16.mxu1 %v1225_v0 }
  0x9c   : > { %875 = vmatpush3.bf16.msra.mxu0 %v1010_v9  ;;  %895 = vmatpush3.bf16.msra.mxu1 %v1018_v15 }
  0x9d   : > { %876 = vmatprep.subr.bf16.mxu0 %v1225_v0  ;;  %896 = vmatprep.subr.bf16.mxu1 %v1225_v0 }
  0xa0   : > { %877 = vmatpush3.bf16.msra.mxu0 %v1011_v11  ;;  %897 = vmatpush3.bf16.msra.mxu1 %v1019_v17 }
  0xa1   : > { %878 = vmatprep.subr.bf16.mxu0 %v1225_v0  ;;  %898 = vmatprep.subr.bf16.mxu1 %v1225_v0 }
  0xa4   : > { %879 = vmatpush3.bf16.msra.mxu0 %v1012_v13  ;;  %899 = vmatpush3.bf16.msra.mxu1 %v1020_v18 }
  0xa5   : > { %904 = vmatprep.subr.bf16.mxu0 %v1225_v0 }
  0xa7   : > { %881 = vmatmul.mubr.bf16.vlgmr.msra.gmra.mrb[0].mxu0 %v357_v16 }
  0xa8   : > { %920 = vmatprep.mubr.msk.bf16.mxu0 %vm1226_vm0, %v1225_v0  ;;  %905 = vmatpush3.bf16.msra.mxu0 %v1021_v19 }
  0xa9   : > { %906 = vmatprep.subr.bf16.mxu0 %v1225_v0 }
  0xac   : > { %907 = vmatpush3.bf16.msra.mxu0 %v1022_v20 }
  0xad   : > { %908 = vmatprep.subr.bf16.mxu0 %v1225_v0 }
  0xb0   : > { %909 = vmatpush3.bf16.msra.mxu0 %v1023_v21 }
  0xb1   : > { %910 = vmatprep.subr.bf16.mxu0 %v1225_v0 }
  0xb4   : > { %911 = vmatpush3.bf16.msra.mxu0 %v1024_v22 }
  0xb5   : > { %912 = vmatprep.subr.bf16.mxu0 %v1225_v0 }
  0xb8   : > { %913 = vmatpush3.bf16.msra.mxu0 %v1025_v23 }
  0xb9   : > { %914 = vmatprep.subr.bf16.mxu0 %v1225_v0 }
  0xbc   : > { %915 = vmatpush3.bf16.msra.mxu0 %v1026_v24 }
  0xbd   : > { %916 = vmatprep.subr.bf16.mxu0 %v1225_v0 }
  0xc0   : > { %917 = vmatpush3.bf16.msra.mxu0 %v1027_v33 }
  0xc1   : > { %918 = vmatprep.subr.bf16.mxu0 %v1225_v0 }
  0xc4   : > { %919 = vmatpush3.bf16.msra.mxu0 %v1028_v34 }
 0x17a   : > { %v446_v26 = vpop.f32.mrb[0].mxu0 }
 0x17b   : > { %v447_v27 = vadd.f32 %v806_v25, %v446_v26  ;;  %v882_v28 = vpop.f32.mrb[1].mxu0 }
 0x17c   : > { %v449_v29 = vpop.f32.mrb[2].mxu0 }
 0x17d   : > { %v452_v30 = vmax.f32 %v447_v27, 0.0  ;;  %v883_v31 = vpop.f32.mrb[3].mxu0 }
 0x17f   : > { %v470_v32 = vpack.c.bf16 %v452_v30, %v452_v30 }
 0x181   : > { %901 = vmatmul.mubr.bf16.vlgmr.msra.gmra.mrb[0].mxu1 %v470_v32 }
 0x254   : > { %v559_v36 = vpop.f32.mrb[0].mxu1 }
 0x255   : > { %v560_v37 = vadd.f32 %v815_v35, %v559_v36  ;;  %v902_v38 = vpop.f32.mrb[1].mxu1 }
 0x256   : > { %v562_v39 = vpop.f32.mrb[2].mxu1 }
 0x257   : > { %v565_v40 = vmax.f32 %v560_v37, 0.0  ;;  %v903_v41 = vpop.f32.mrb[3].mxu1 }
 0x259   : > { %v583_v42 = vpack.c.bf16 %v565_v40, %v565_v40 }
 0x25b   : > { %921 = vmatmul.mubr.bf16.vlgmr.msra.gmra.mrb[4].mxu0 %v583_v42 }
 0x32e   : > { %v672_v44 = vpop.f32.mrb[4].mxu0 }
 0x32f   : > { %v673_v45 = vadd.f32 %v824_v43, %v672_v44  ;;  %v922_v46 = vpop.f32.mrb[5].mxu0 }
 0x330   : > { %v675_v47 = vpop.f32.mrb[6].mxu0 }
 0x331   : > { %678 = vst [vmem:[%s337_s20] sm:$0xff] %v673_v45  ;;  %v923_v48 = vpop.f32.mrb[7].mxu0 }
 0x332   : > { %1156 = shalt.err (!%p1153_p4)
}
 0x333   : > { %s1157_s8 = scalar_lea.hbm %s1533_s21, 128  ;;  %s1161_s11 = scalar_lea.hbm %s1584_s7, 256 }
 0x334   : > { %p1158_p0 = scmp.ne.s32.totalorder %s1533_s21, %s1157_s8  ;;  %p1162_p8 = scmp.lt.u32.totalorder %s1533_s21, %s1584_s7 }
 0x335   : > { %p1163_p13 = scmp.lt.u32.totalorder %s1161_s11, %s1157_s8  ;;  %p1165_p10 = scmp.lt.u32.totalorder %s1157_s8, %s1533_s21 }
 0x336   : > { %p1159_p9 = pnand %p1158_p0, %p1422_p5 }
 0x337   : > { %p1164_p6 = por %p1163_p13, %p1162_p8 }
 0x338   : > { %p1160_p11 = pneg %p1159_p9 }
 0x339   : > { %p1166_p3 = por %p1165_p10, %p1164_p6 }
 0x33b   : > { %p1167_p7 = pnand %p1166_p3, %p1160_p11 }
 0x33d   : > { %1170 = shalt.err (!%p1167_p7)
}
 0x33e   : > { %938 = dma.vmem_to_hbm [thread:$0]  (%p1422_p5), %s1535_s15, 128, %s1533_s21, %s680_s28  }
 0x33f PF: > { %s1604_s20 = sld [smem:[#allocation15_spill]]  ;;  %s705_s29 = sand.u32 1, %s1205_s24  }
 0x340   : > { %p1606_p1 = scmp.ge.s32.totalorder %s1217_s27, 2  ;;  %s706_s12 = scalar_lea.sflag [#allocation4], %s705_s29 }
 0x345   : > { %p1605_p12 = scmp.ne.s32.totalorder %s1604_s20, 0 }
 0x347   : > { %p955_p2 = pnand %p1606_p1, %p1605_p12 }
 0x349   : > { %1200 = dma.done.wait (!%p955_p2), %s706_s12, 128  }
 0x34a   : > { %1202 = vsyncadd (!%p955_p2), %s706_s12, 4294967168  ;;  %p22_p4 = scmp.ge.s32.totalorder %s1408_s22, 4   ;;  %s1607_s24 = smov %s1209_s25 }
 0x34b   : > { %s1608_s25 = smov %s1213_s26  ;;  %s1609_s26 = smov %s1418_s18 }
 0x34c   : > { %s1610_s27 = smov %s1408_s22  ;;  %24 = sbr.rel (!%p22_p4) target bundleno = 7 (0x7), region = 105 }
 0x353   :  { %711 = vsyncpa [#allocation3], 1 }
 0x354   :  { %713 = vsyncpa [#allocation3 + $0x1], 1 }
 0x355   :  { %714 = vsyncpa [#allocation6], 1 }
 0x356   :  { %715 = vsyncpa [#allocation9], 1 }
 0x357   :  { %716 = vsyncpa [#allocation4], 1 }
 0x358   :  { %718 = vsyncpa [#allocation4 + $0x1], 1 }

// kernel: tpu_custom_call.1
= control target key start
LH: loop header
LB: loop body
LE: loop exit
PB: predicated region body
PF: predicated region fallthrough
CT: control target
= control target key end

     0   :  { %12 = vsyncpa [#allocation3], 0  ;;  %s1577_s0 = inlined_call_operand.hbm [shape: f32[16,128], index: 0, kind: input, shape index: {}]   ;;  %s1578_s1 = inlined_call_operand.hbm [shape: bf16[128,128], index: 1, kind: input, shape index: {}]   ;;  %s1579_s2 = inlined_call_operand.vmem [shape: f32[1,128], index: 2, kind: input, shape index: {}]   ;;  %s1580_s3 = inlined_call_operand.hbm [shape: bf16[128,128], index: 3, kind: input, shape index: {}]   ;;  %s1581_s4 = inlined_call_operand.vmem [shape: f32[1,128], index: 4, kind: input, shape index: {}]   ;;  %s1582_s5 = inlined_call_operand.hbm [shape: bf16[128,128], index: 5, kind: input, shape index: {}]   ;;  %s1583_s6 = inlined_call_operand.vmem [shape: f32[1,128], index: 6, kind: input, shape index: {}]   ;;  %s1584_s7 = inlined_call_operand.hbm [shape: f32[16,128], index: 7, kind: output, shape index: {}]  }
   0x1   :  { %14 = vsyncpa [#allocation3 + $0x1], 0 }
   0x2   :  { %15 = vsyncpa [#allocation6], 0 }
   0x3   :  { %16 = vsyncpa [#allocation9], 0 }
   0x4   :  { %17 = vsyncpa [#allocation4], 0 }
   0x5   :  { %19 = vsyncpa [#allocation4 + $0x1], 0  ;;  %s1268_s24 = smov 0   ;;  %s1270_s25 = smov 0  }
   0x6   :  { %s1272_s26 = smov 0   ;;  %s1274_s27 = smov 0  }
   0x7 LB: > { %s1289_s28 = sadd.s32 4294967295, %s1217_s27   ;;  %s792_s29 = sadd.s32 4294967294, %s1217_s27   ;;  %s1217_s27 = sphi %s1274_s27, %s1610_s27   ;;  %s1213_s26 = sphi %s1272_s26, %s1609_s26   ;;  %s1209_s25 = sphi %s1270_s25, %s1608_s25   ;;  %s1205_s24 = sphi %s1268_s24, %s1607_s24  }
   0x8   : > { %p45_p0 = scmp.ne.s32.totalorder %s1209_s25, %s1205_s24  ;;  %p1585_p1 = scmp.eq.s32.totalorder %s1289_s28, 0 }
   0x9   : > { %p201_p3 = scmp.eq.s32.totalorder %s792_s29, 1  ;;  %p793_p5 = scmp.ge.s32.totalorder %s1217_s27, 1 }
   0xa   : > { %p1298_p4 = por %p1585_p1, %p45_p0  ;;  %p208_p7 = scmp.lt.s32.totalorder %s1217_s27, 3 }
   0xb   : > { %p1303_p6 = por %p201_p3, %p45_p0  ;;  %s1219_s10 = smov [#allocation5]  }
   0xc   : > { %s1589_s30 = scalar_select %p1298_p4, 1, 0 }
   0xd   : > { %s1590_s8 = scalar_select %p1303_p6, 1, 0 }
   0xe   : > { %p1308_p8 = pnand %p793_p5, %p208_p7  ;;  %s220_s11 = sshll.u32 %s1219_s10, 4  ;;  %s1312_s11 = int_to_ptr.vmem [resolvable:$true] %s220_s11 }
   0xf   : > { %1591 = sst [smem:[#allocation15_spill]] %s1590_s8  ;;  %s1220_s13 = smov [#allocation7]  }
  0x10   : > { %s1592_s9 = scalar_select %p1308_p8, 1, 0 }
  0x11   : > { %p940_p9 = pneg %p1308_p8  ;;  %s236_s14 = sshll.u32 %s1220_s13, 4  ;;  %s1323_s14 = int_to_ptr.vmem [resolvable:$true] %s236_s14 }
  0x12   : > { %s1221_s15 = smov [#allocation8]   ;;  %s1029_s19 = scalar_lea.hbm %s1578_s1, 1024 }
  0x13   : > { %p1319_p11 = pnand %p940_p9, %p1585_p1  ;;  %s1325_s16 = sshll.u32 %s1221_s15, 4  ;;  %s253_s16 = int_to_ptr.vmem [resolvable:$true] %s1325_s16 }
  0x14   : > { %p1030_p12 = scmp.ne.s32.totalorder %s1578_s1, %s1029_s19  ;;  %p1036_p5 = scmp.lt.u32.totalorder %s1029_s19, %s1578_s1 }
  0x15   : > { %p1335_p13 = pneg %p1319_p11 }
  0x17   : > { %p1032_p0 = pnand %p1335_p13, %p1030_p12 }
  0x19   : > { %p1033_p3 = pneg %p1032_p0 }
  0x1b   : > { %p1038_p7 = pnand %p1036_p5, %p1033_p3 }
  0x1d   : > { %1041 = shalt.err (!%p1038_p7)
}
  0x1e   : > { %s1042_s10 = scalar_lea.vmem %s1312_s11, 1024  ;;  %p1050_p2 = scmp.lt.s32.totalorder %s1312_s11, %s1312_s11 }
  0x1f   : > { %p1043_p9 = scmp.ne.s32.totalorder %s1312_s11, %s1042_s10  ;;  %p1051_p6 = scmp.lt.s32.totalorder %s1042_s10, %s1042_s10 }
  0x21   : > { %p1045_p10 = pnand %p1043_p9, %p1335_p13  ;;  %p1052_p12 = por %p1051_p6, %p1050_p2 }
  0x23   : > { %p1046_p1 = pneg %p1045_p10 }
  0x25   : > { %p1053_p0 = pnand %p1052_p12, %p1046_p1 }
  0x27   : > { %1056 = shalt.err (!%p1053_p0)
}
  0x28   : > { %s1222_s13 = smov 64   ;;  %s1223_s15 = smov 4  }
  0x29   : > { %943 = dma.hbm_to_vmem [thread:$0]  (!%p1319_p11), %s1578_s1, 1024, %s1312_s11, [#allocation6], %s1222_s13, %s1222_s13, %s1223_s15  }
  0x2a   : > { %s1057_s21 = scalar_lea.hbm %s1580_s3, 1024 }
  0x2b   : > { %p1058_p1 = scmp.ne.s32.totalorder %s1580_s3, %s1057_s21  ;;  %p1064_p10 = scmp.lt.u32.totalorder %s1057_s21, %s1580_s3 }
  0x2d   : > { %p1060_p2 = pnand %p1058_p1, %p1335_p13 }
  0x2f   : > { %p1061_p6 = pneg %p1060_p2 }
  0x31   : > { %p1066_p3 = pnand %p1064_p10, %p1061_p6 }
  0x33   : > { %1069 = shalt.err (!%p1066_p3)
}
  0x34   : > { %s1070_s11 = scalar_lea.vmem %s1323_s14, 1024  ;;  %p1078_p12 = scmp.lt.s32.totalorder %s1323_s14, %s1323_s14 }
  0x35   : > { %p1071_p5 = scmp.ne.s32.totalorder %s1323_s14, %s1070_s11  ;;  %p1079_p0 = scmp.lt.s32.totalorder %s1070_s11, %s1070_s11 }
  0x37   : > { %p1073_p7 = pnand %p1071_p5, %p1335_p13  ;;  %p1080_p1 = por %p1079_p0, %p1078_p12 }
  0x39   : > { %p1074_p9 = pneg %p1073_p7 }
  0x3b   : > { %p1081_p2 = pnand %p1080_p1, %p1074_p9 }
  0x3d   : > { %1084 = shalt.err (!%p1081_p2)
}
  0x3e   : > { %946 = dma.hbm_to_vmem [thread:$0]  (!%p1319_p11), %s1580_s3, 1024, %s1323_s14, [#allocation6], %s1222_s13, %s1222_s13, %s1223_s15  }
  0x3f   : > { %s1085_s20 = scalar_lea.hbm %s1582_s5, 1024 }
  0x40   : > { %p1086_p6 = scmp.ne.s32.totalorder %s1582_s5, %s1085_s20  ;;  %p1092_p5 = scmp.lt.u32.totalorder %s1085_s20, %s1582_s5 }
  0x42   : > { %p1088_p10 = pnand %p1086_p6, %p1335_p13 }
  0x44   : > { %p1089_p3 = pneg %p1088_p10 }
  0x46   : > { %p1094_p7 = pnand %p1092_p5, %p1089_p3 }
  0x48   : > { %1097 = shalt.err (!%p1094_p7)
}
  0x49   : > { %s1098_s11 = scalar_lea.vmem %s253_s16, 1024  ;;  %p1106_p1 = scmp.lt.s32.totalorder %s253_s16, %s253_s16 }
  0x4a   : > { %p1099_p9 = scmp.ne.s32.totalorder %s253_s16, %s1098_s11  ;;  %p1107_p2 = scmp.lt.s32.totalorder %s1098_s11, %s1098_s11 }
  0x4c   : > { %p1101_p12 = pnand %p1099_p9, %p1335_p13  ;;  %p1108_p4 = por %p1107_p2, %p1106_p1 }
  0x4e   : > { %p1102_p0 = pneg %p1101_p12 }
  0x50   : > { %p1109_p8 = pnand %p1108_p4, %p1102_p0 }
  0x52   : > { %1112 = shalt.err (!%p1109_p8)
}
  0x53   : > { %949 = dma.hbm_to_vmem [thread:$0]  (!%p1319_p11), %s1582_s5, 1024, %s253_s16, [#allocation9], %s1222_s13, %s1222_s13, %s1223_s15  }
  0x54   : > { %s1408_s22 = sadd.s32 1, %s1217_s27   ;;  %s32_s17 = sadd.s32 1, %s1213_s26 }
  0x55   : > { %s29_s12 = ssub.s32 %s1217_s27, %s1408_s22  ;;  %p39_p8 = scmp.ne.s32.totalorder %s1213_s26, %s1209_s25 }
  0x56   : > { %p30_p4 = scmp.eq.s32.totalorder %s29_s12, 0  ;;  %p40_p13 = scmp.eq.s32.totalorder %s1217_s27, 0 }
  0x57   : > { %p961_p6 = scmp.lt.s32.totalorder %s1217_s27, 2  ;;  %p1595_p3 = scmp.eq.s32.totalorder %s1289_s28, 1 }
  0x58   : > { %s1418_s18 = scalar_select %p30_p4, %s1213_s26, %s32_s17  }
  0x59   : > { %p41_p10 = por %p40_p13, %p39_p8  ;;  %p1422_p5 = por %p1595_p3, %p39_p8 }
  0x5a   : > { %s269_s20 = sand.u32 1, %s1213_s26   ;;  %s799_s21 = sshll.u32 %s1217_s27, 7 }
  0x5b   : > { %s798_s16 = sshll.u32 %s269_s20, 3  ;;  %s1431_s23 = scalar_lea.hbm %s1577_s0, %s799_s21 }
  0x5c   : > { %s273_s29 = scalar_lea.vmem [#allocation2], %s798_s16  ;;  %p1433_p11 = pnand %p961_p6, %p41_p10 }
  0x5d   : > { %s280_s10 = sshll.u32 %s273_s29, 4  ;;  %s270_s14 = scalar_lea.sflag [#allocation3], %s269_s20  ;;  %s1437_s10 = int_to_ptr.vmem [resolvable:$true] %s280_s10 }
  0x5e   : > { %s1113_s8 = scalar_lea.hbm %s1431_s23, 128  ;;  %p1115_p9 = pneg %p1433_p11 }
  0x5f   : > { %p1114_p7 = scmp.ne.s32.totalorder %s1431_s23, %s1113_s8  ;;  %s1118_s21 = scalar_lea.hbm %s1577_s0, 256 }
  0x60   : > { %p1119_p1 = scmp.lt.u32.totalorder %s1431_s23, %s1577_s0  ;;  %p1120_p2 = scmp.lt.u32.totalorder %s1118_s21, %s1113_s8 }
  0x61   : > { %p1116_p12 = pnand %p1115_p9, %p1114_p7  ;;  %p1122_p8 = scmp.lt.u32.totalorder %s1113_s8, %s1431_s23 }
  0x62   : > { %p1121_p4 = por %p1120_p2, %p1119_p1 }
  0x63   : > { %p1117_p0 = pneg %p1116_p12 }
  0x64   : > { %p1123_p13 = por %p1122_p8, %p1121_p4 }
  0x66   : > { %p1124_p6 = pnand %p1123_p13, %p1117_p0 }
  0x68   : > { %1127 = shalt.err (!%p1124_p6)
}
  0x69   : > { %s1128_s20 = scalar_lea.vmem %s1437_s10, 128  ;;  %s1224_s15 = smov [#allocation2]  }
  0x6a   : > { %p1129_p10 = scmp.ne.s32.totalorder %s1437_s10, %s1128_s20  ;;  %s1133_s29 = sshll.u32 %s1224_s15, 4  ;;  %s1134_s29 = int_to_ptr.vmem [resolvable:$false] %s1133_s29 }
  0x6b   : > { %s1135_s12 = scalar_lea.vmem %s1134_s29, 256  ;;  %p1136_p12 = scmp.lt.s32.totalorder %s1437_s10, %s1134_s29 }
  0x6c   : > { %p1131_p3 = pnand %p1129_p10, %p1115_p9  ;;  %p1137_p1 = scmp.lt.s32.totalorder %s1135_s12, %s1128_s20 }
  0x6e   : > { %p1132_p7 = pneg %p1131_p3  ;;  %p1138_p2 = por %p1137_p1, %p1136_p12 }
  0x70   : > { %p1139_p4 = pnand %p1138_p2, %p1132_p7 }
  0x72   : > { %1142 = shalt.err (!%p1139_p4)
}
  0x73   : > { %953 = dma.hbm_to_vmem [thread:$0]  (!%p1433_p11), %s1431_s23, 128, %s1437_s10, %s270_s14  }
  0x74   : > { %p1598_p0 = scmp.ne.s32.totalorder %s1592_s9, 0 }
  0x75   : > { %s1467_s8 = sand.u32 (!%p1598_p0), 1, %s1209_s25   ;;  %p1599_p9 = scmp.ne.s32.totalorder (!%p1598_p0), %s1589_s30, 0 }
  0x76   : > { %289 = sbr.rel (%p1598_p0) target bundleno = 831 (0x33f), region = 48  ;;  %s801_s17 = sshll.u32 (!%p1598_p0), %s1467_s8, 3 }
  0x77   : > { %s292_s21 = scalar_lea.sflag (!%p1598_p0), [#allocation3], %s1467_s8  ;;  %s1473_s16 = scalar_lea.vmem (!%p1598_p0), [#allocation2], %s801_s17 }
  0x7d   : > { %1188 = dma.done.wait (%p1599_p9), %s292_s21, 128  }
  0x7e   : > { %1190 = vsyncadd (%p1599_p9), %s292_s21, 4294967168  ;;  %p1600_p11 = scmp.eq.s32.totalorder %s1289_s28, 0 }
  0x80   : > { %1192 = dma.done.wait (%p1600_p11), [#allocation6], 2048   ;;  %p1601_p8 = pmov %p1600_p11 }
  0x82   : > { %1194 = vsyncadd (%p1601_p8), [#allocation6], 4294965248  ;;  %p1602_p13 = pmov %p1601_p8 }
  0x83   : > { %p1603_p6 = pmov %p1601_p8 }
  0x84   : > { %1196 = dma.done.wait (%p1602_p13), [#allocation9], 1024  }
  0x85   : > { %1198 = vsyncadd (%p1603_p6), [#allocation9], 4294966272  ;;  %v1225_v0 = vmov 0.0   ;;  %vm1226_vm0 = vmmov 0   ;;  %v1005_v1 = vld [vmem:[#allocation5] sm:$0xff]   ;;  %v1006_v2 = vld [vmem:[#allocation5 + $0x8] sm:$0xff]  }
  0x86   : > { %864 = vmatprep.subr.bf16.mxu0 %v1225_v0  ;;  %880 = vmatprep.mubr.msk.bf16.mxu0 %vm1226_vm0, %v1225_v0  ;;  %v1007_v3 = vld [vmem:[#allocation5 + $0x10] sm:$0xff]   ;;  %v1013_v4 = vld [vmem:[#allocation7] sm:$0xff]   ;;  %v1008_v5 = vld [vmem:[#allocation5 + $0x18] sm:$0xff]   ;;  %s834_s13 = sshll.u32 %s1289_s28, 7  ;;  %s337_s20 = scalar_lea.vmem [#allocation10], %s801_s17 }
  0x87   : > { %884 = vmatprep.subr.bf16.mxu1 %v1225_v0  ;;  %900 = vmatprep.mubr.msk.bf16.mxu1 %vm1226_vm0, %v1225_v0  ;;  %v1014_v6 = vld [vmem:[#allocation7 + $0x8] sm:$0xff]   ;;  %v1009_v7 = vld [vmem:[#allocation5 + $0x20] sm:$0xff]   ;;  %v1015_v8 = vld [vmem:[#allocation7 + $0x10] sm:$0xff]   ;;  %s693_s15 = sshll.u32 %s337_s20, 4  ;;  %s1533_s21 = scalar_lea.hbm %s1584_s7, %s834_s13  ;;  %s1535_s15 = int_to_ptr.vmem [resolvable:$true] %s693_s15 }
  0x88   : > { %865 = vmatpush3.bf16.msra.mxu0 %v1005_v1  ;;  %885 = vmatpush3.bf16.msra.mxu1 %v1013_v4  ;;  %v1010_v9 = vld [vmem:[#allocation5 + $0x28] sm:$0xff]   ;;  %v1016_v10 = vld [vmem:[#allocation7 + $0x18] sm:$0xff]   ;;  %v1011_v11 = vld [vmem:[#allocation5 + $0x30] sm:$0xff]   ;;  %s680_s28 = scalar_lea.sflag [#allocation4], %s1467_s8  ;;  %s1227_s17 = smov [#allocation10]  }
  0x89   : > { %866 = vmatprep.subr.bf16.mxu0 %v1225_v0  ;;  %886 = vmatprep.subr.bf16.mxu1 %v1225_v0  ;;  %v1017_v12 = vld [vmem:[#allocation7 + $0x20] sm:$0xff]   ;;  %v1012_v13 = vld [vmem:[#allocation5 + $0x38] sm:$0xff]   ;;  %v1018_v15 = vld [vmem:[#allocation7 + $0x28] sm:$0xff]   ;;  %s1147_s30 = sshll.u32 %s1227_s17, 4  ;;  %s1148_s30 = int_to_ptr.vmem [resolvable:$false] %s1147_s30 }
  0x8a   : > { %v339_v14 = vld [vmem:[%s1473_s16] sm:$0xff]  ;;  %v1021_v19 = vld [vmem:[#allocation8] sm:$0xff]   ;;  %v1022_v20 = vld [vmem:[#allocation8 + $0x8] sm:$0xff]   ;;  %s1143_s16 = scalar_lea.vmem %s1535_s15, 128  ;;  %s1149_s9 = scalar_lea.vmem %s1148_s30, 256 }
  0x8b   : > { %v357_v16 = vpack.c.bf16 %v339_v14, %v339_v14  ;;  %v1019_v17 = vld [vmem:[#allocation7 + $0x30] sm:$0xff]   ;;  %v1020_v18 = vld [vmem:[#allocation7 + $0x38] sm:$0xff]   ;;  %v1025_v23 = vld [vmem:[#allocation8 + $0x20] sm:$0xff]   ;;  %p1144_p10 = scmp.ne.s32.totalorder %s1535_s15, %s1143_s16  ;;  %p1150_p12 = scmp.lt.s32.totalorder %s1535_s15, %s1148_s30 }
  0x8c   : > { %867 = vmatpush3.bf16.msra.mxu0 %v1006_v2  ;;  %887 = vmatpush3.bf16.msra.mxu1 %v1014_v6  ;;  %v1023_v21 = vld [vmem:[#allocation8 + $0x10] sm:$0xff]   ;;  %v1024_v22 = vld [vmem:[#allocation8 + $0x18] sm:$0xff]   ;;  %v1026_v24 = vld [vmem:[#allocation8 + $0x28] sm:$0xff]   ;;  %p1151_p1 = scmp.lt.s32.totalorder %s1149_s9, %s1143_s16 }
  0x8d   : > { %868 = vmatprep.subr.bf16.mxu0 %v1225_v0  ;;  %888 = vmatprep.subr.bf16.mxu1 %v1225_v0  ;;  %v806_v25 = vld [vmem:[%s1579_s2] ss:$0 sm:$0xff]  ;;  %v1028_v34 = vld [vmem:[#allocation8 + $0x38] sm:$0xff]   ;;  %p1145_p3 = pnand %p1144_p10, %p1422_p5 }
  0x8e   : > { %v1027_v33 = vld [vmem:[#allocation8 + $0x30] sm:$0xff]   ;;  %p1152_p2 = por %p1151_p1, %p1150_p12 }
  0x8f   : > { %v815_v35 = vld [vmem:[%s1581_s4] ss:$0 sm:$0xff]  ;;  %p1146_p7 = pneg %p1145_p3 }
  0x90   : > { %869 = vmatpush3.bf16.msra.mxu0 %v1007_v3  ;;  %889 = vmatpush3.bf16.msra.mxu1 %v1015_v8  ;;  %v824_v43 = vld [vmem:[%s1583_s6] ss:$0 sm:$0xff] }
  0x91   : > { %870 = vmatprep.subr.bf16.mxu0 %v1225_v0  ;;  %890 = vmatprep.subr.bf16.mxu1 %v1225_v0  ;;  %p1153_p4 = pnand %p1152_p2, %p1146_p7 }
  0x94   : > { %871 = vmatpush3.bf16.msra.mxu0 %v1008_v5  ;;  %891 = vmatpush3.bf16.msra.mxu1 %v1016_v10 }
  0x95   : > { %872 = vmatprep.subr.bf16.mxu0 %v1225_v0  ;;  %892 = vmatprep.subr.bf16.mxu1 %v1225_v0 }
  0x98   : > { %873 = vmatpush3.bf16.msra.mxu0 %v1009_v7  ;;  %893 = vmatpush3.bf16.msra.mxu1 %v1017_v12 }
  0x99   : > { %874 = vmatprep.subr.bf16.mxu0 %v1225_v0  ;;  %894 = vmatprep.subr.bf16.mxu1 %v1225_v0 }
  0x9c   : > { %875 = vmatpush3.bf16.msra.mxu0 %v1010_v9  ;;  %895 = vmatpush3.bf16.msra.mxu1 %v1018_v15 }
  0x9d   : > { %876 = vmatprep.subr.bf16.mxu0 %v1225_v0  ;;  %896 = vmatprep.subr.bf16.mxu1 %v1225_v0 }
  0xa0   : > { %877 = vmatpush3.bf16.msra.mxu0 %v1011_v11  ;;  %897 = vmatpush3.bf16.msra.mxu1 %v1019_v17 }
  0xa1   : > { %878 = vmatprep.subr.bf16.mxu0 %v1225_v0  ;;  %898 = vmatprep.subr.bf16.mxu1 %v1225_v0 }
  0xa4   : > { %879 = vmatpush3.bf16.msra.mxu0 %v1012_v13  ;;  %899 = vmatpush3.bf16.msra.mxu1 %v1020_v18 }
  0xa5   : > { %904 = vmatprep.subr.bf16.mxu0 %v1225_v0 }
  0xa7   : > { %881 = vmatmul.mubr.bf16.vlgmr.msra.gmra.mrb[0].mxu0 %v357_v16 }
  0xa8   : > { %920 = vmatprep.mubr.msk.bf16.mxu0 %vm1226_vm0, %v1225_v0  ;;  %905 = vmatpush3.bf16.msra.mxu0 %v1021_v19 }
  0xa9   : > { %906 = vmatprep.subr.bf16.mxu0 %v1225_v0 }
  0xac   : > { %907 = vmatpush3.bf16.msra.mxu0 %v1022_v20 }
  0xad   : > { %908 = vmatprep.subr.bf16.mxu0 %v1225_v0 }
  0xb0   : > { %909 = vmatpush3.bf16.msra.mxu0 %v1023_v21 }
  0xb1   : > { %910 = vmatprep.subr.bf16.mxu0 %v1225_v0 }
  0xb4   : > { %911 = vmatpush3.bf16.msra.mxu0 %v1024_v22 }
  0xb5   : > { %912 = vmatprep.subr.bf16.mxu0 %v1225_v0 }
  0xb8   : > { %913 = vmatpush3.bf16.msra.mxu0 %v1025_v23 }
  0xb9   : > { %914 = vmatprep.subr.bf16.mxu0 %v1225_v0 }
  0xbc   : > { %915 = vmatpush3.bf16.msra.mxu0 %v1026_v24 }
  0xbd   : > { %916 = vmatprep.subr.bf16.mxu0 %v1225_v0 }
  0xc0   : > { %917 = vmatpush3.bf16.msra.mxu0 %v1027_v33 }
  0xc1   : > { %918 = vmatprep.subr.bf16.mxu0 %v1225_v0 }
  0xc4   : > { %919 = vmatpush3.bf16.msra.mxu0 %v1028_v34 }
 0x17a   : > { %v446_v26 = vpop.f32.mrb[0].mxu0 }
 0x17b   : > { %v447_v27 = vadd.f32 %v806_v25, %v446_v26  ;;  %v882_v28 = vpop.f32.mrb[1].mxu0 }
 0x17c   : > { %v449_v29 = vpop.f32.mrb[2].mxu0 }
 0x17d   : > { %v452_v30 = vmax.f32 %v447_v27, 0.0  ;;  %v883_v31 = vpop.f32.mrb[3].mxu0 }
 0x17f   : > { %v470_v32 = vpack.c.bf16 %v452_v30, %v452_v30 }
 0x181   : > { %901 = vmatmul.mubr.bf16.vlgmr.msra.gmra.mrb[0].mxu1 %v470_v32 }
 0x254   : > { %v559_v36 = vpop.f32.mrb[0].mxu1 }
 0x255   : > { %v560_v37 = vadd.f32 %v815_v35, %v559_v36  ;;  %v902_v38 = vpop.f32.mrb[1].mxu1 }
 0x256   : > { %v562_v39 = vpop.f32.mrb[2].mxu1 }
 0x257   : > { %v565_v40 = vmax.f32 %v560_v37, 0.0  ;;  %v903_v41 = vpop.f32.mrb[3].mxu1 }
 0x259   : > { %v583_v42 = vpack.c.bf16 %v565_v40, %v565_v40 }
 0x25b   : > { %921 = vmatmul.mubr.bf16.vlgmr.msra.gmra.mrb[4].mxu0 %v583_v42 }
 0x32e   : > { %v672_v44 = vpop.f32.mrb[4].mxu0 }
 0x32f   : > { %v673_v45 = vadd.f32 %v824_v43, %v672_v44  ;;  %v922_v46 = vpop.f32.mrb[5].mxu0 }
 0x330   : > { %v675_v47 = vpop.f32.mrb[6].mxu0 }
 0x331   : > { %678 = vst [vmem:[%s337_s20] sm:$0xff] %v673_v45  ;;  %v923_v48 = vpop.f32.mrb[7].mxu0 }
 0x332   : > { %1156 = shalt.err (!%p1153_p4)
}
 0x333   : > { %s1157_s8 = scalar_lea.hbm %s1533_s21, 128  ;;  %s1161_s11 = scalar_lea.hbm %s1584_s7, 256 }
 0x334   : > { %p1158_p0 = scmp.ne.s32.totalorder %s1533_s21, %s1157_s8  ;;  %p1162_p8 = scmp.lt.u32.totalorder %s1533_s21, %s1584_s7 }
 0x335   : > { %p1163_p13 = scmp.lt.u32.totalorder %s1161_s11, %s1157_s8  ;;  %p1165_p10 = scmp.lt.u32.totalorder %s1157_s8, %s1533_s21 }
 0x336   : > { %p1159_p9 = pnand %p1158_p0, %p1422_p5 }
 0x337   : > { %p1164_p6 = por %p1163_p13, %p1162_p8 }
 0x338   : > { %p1160_p11 = pneg %p1159_p9 }
 0x339   : > { %p1166_p3 = por %p1165_p10, %p1164_p6 }
 0x33b   : > { %p1167_p7 = pnand %p1166_p3, %p1160_p11 }
 0x33d   : > { %1170 = shalt.err (!%p1167_p7)
}
 0x33e   : > { %938 = dma.vmem_to_hbm [thread:$0]  (%p1422_p5), %s1535_s15, 128, %s1533_s21, %s680_s28  }
 0x33f PF: > { %s1604_s20 = sld [smem:[#allocation15_spill]]  ;;  %s705_s29 = sand.u32 1, %s1205_s24  }
 0x340   : > { %p1606_p1 = scmp.ge.s32.totalorder %s1217_s27, 2  ;;  %s706_s12 = scalar_lea.sflag [#allocation4], %s705_s29 }
 0x345   : > { %p1605_p12 = scmp.ne.s32.totalorder %s1604_s20, 0 }
 0x347   : > { %p955_p2 = pnand %p1606_p1, %p1605_p12 }
 0x349   : > { %1200 = dma.done.wait (!%p955_p2), %s706_s12, 128  }
 0x34a   : > { %1202 = vsyncadd (!%p955_p2), %s706_s12, 4294967168  ;;  %p22_p4 = scmp.ge.s32.totalorder %s1408_s22, 4   ;;  %s1607_s24 = smov %s1209_s25 }
 0x34b   : > { %s1608_s25 = smov %s1213_s26  ;;  %s1609_s26 = smov %s1418_s18 }
 0x34c   : > { %s1610_s27 = smov %s1408_s22  ;;  %24 = sbr.rel (!%p22_p4) target bundleno = 7 (0x7), region = 105 }
 0x353   :  { %711 = vsyncpa [#allocation3], 1 }
 0x354   :  { %713 = vsyncpa [#allocation3 + $0x1], 1 }
 0x355   :  { %714 = vsyncpa [#allocation6], 1 }
 0x356   :  { %715 = vsyncpa [#allocation9], 1 }
 0x357   :  { %716 = vsyncpa [#allocation4], 1 }
 0x358   :  { %718 = vsyncpa [#allocation4 + $0x1], 1 }

</bundles_post_ra>
